<compile_context>
chip_gen: v7x
topology: tpu7x:2x2x1
jax: 0.10.0
libtpu: 0.0.40
codegen_flags: <defaults>
</compile_context>

<pallas_src>
import functools

import jax
import jax.numpy as jnp
from jax.experimental import pallas as pl
from jax.experimental.pallas import tpu as pltpu


def _round_up(x, m):
    return ((x + m - 1) // m) * m


def _layernorm_kernel(x_ref, o_ref, *, h):
    # x_ref: (tile_rows, H) block in VMEM; reduce over lanes (last axis).
    # Last block dim equals the full H, so reductions see exact data — no
    # lane mask / iota / where needed.
    x = x_ref[...].astype(jnp.float32)
    s1 = jnp.sum(x, axis=-1, keepdims=True)
    mean = s1 * (1.0 / h)
    diff = x - mean
    s2 = jnp.sum(diff * diff, axis=-1, keepdims=True)
    # Unbiased variance: var = s2 / (h - 1).  Invert only the (tr, 1) column,
    # then one full-width multiply — no per-element divide.  (The module uses
    # no epsilon, so a constant row gives inf/nan, same as PyTorch.)
    inv_var = (h - 1.0) / s2
    o_ref[...] = (diff * inv_var).astype(o_ref.dtype)


def layer_normalization(x, *, vmem_budget_bytes=32 * 1024 * 1024,
                        max_tile_rows=16384):
    """(x - mean) / var with mean/var (unbiased) over dim=2 of a (B, S, H) array."""
    B, S, H = x.shape
    rows = B * S
    itemsize = jnp.dtype(x.dtype).itemsize
    x2d = x.reshape(rows, H)  # contiguous reshape: no HBM round trip

    # Sublane packing for dtype: 8 f32 / 16 bf16 / 32 int8.
    sub = max(8, 32 // itemsize)

    # --- row-tile selection against a modest fixed VMEM budget ---------------
    # Live bytes/row ~ double-buffered input + output blocks (input dtype)
    # plus ~4 f32 full-block temporaries inside the kernel body.
    per_row_bytes = H * (4 * itemsize + 4 * 4)
    tr = (vmem_budget_bytes - (2 << 20)) // per_row_bytes
    tr = max(sub, min(tr, max_tile_rows))
    tr = (tr // sub) * sub
    # Never allocate a block bigger than the (sublane-rounded) data.
    tr = min(tr, _round_up(rows, sub))
    # Keep the grid >= 2 steps when rows permit, so dimension_semantics
    # ('parallel',) can shard the loop across both TensorCores on v7x.
    if rows > sub and tr >= _round_up(rows, sub):
        tr = max(sub, _round_up(pl.cdiv(rows, 2), sub))

    grid = (pl.cdiv(rows, tr),)  # ragged last block: OOB writes are dropped
    kernel = functools.partial(_layernorm_kernel, h=H)

    cost = pl.CostEstimate(
        flops=5 * rows * H,
        transcendentals=0,
        bytes_accessed=2 * rows * H * itemsize,
    )

    out2d = pl.pallas_call(
        kernel,
        out_shape=jax.ShapeDtypeStruct((rows, H), x.dtype),
        grid_spec=pltpu.PrefetchScalarGridSpec(
            num_scalar_prefetch=0,
            grid=grid,
            in_specs=[pl.BlockSpec((tr, H), lambda i: (i, 0))],
            out_specs=pl.BlockSpec((tr, H), lambda i: (i, 0)),
        ),
        compiler_params=pltpu.CompilerParams(
            dimension_semantics=("parallel",),
            vmem_limit_bytes=int(vmem_budget_bytes),
        ),
        cost_estimate=cost,
    )(x2d)

    return out2d.reshape(B, S, H)


if __name__ == "__main__":
    def ref_fn(x):
        mean = jnp.mean(x, axis=2, keepdims=True)
        var = jnp.sum((x - mean) ** 2, axis=2, keepdims=True) / (x.shape[2] - 1)
        return (x - mean) / var

    key = jax.random.PRNGKey(0)

    # (B, S, H) with H < 128: exercises the full-dim (unpadded) lane block.
    x1 = jax.random.normal(key, (2, 8, 32), dtype=jnp.float32)
    out1 = jax.block_until_ready(layer_normalization(x1))
    assert jnp.allclose(out1, ref_fn(x1), atol=1e-5, rtol=1e-5), "mismatch (H=32)"

    # Odd row count (15) + lane-aligned H: exercises the ragged last block
    # (dropped OOB writes) and the >=2-step grid path.
    x2 = jax.random.normal(jax.random.PRNGKey(0), (3, 5, 256), dtype=jnp.float32)
    out2 = jax.block_until_ready(layer_normalization(x2))
    assert jnp.allclose(out2, ref_fn(x2), atol=1e-5, rtol=1e-5), "mismatch (H=256)"

    print("KERNEL_OK")
</pallas_src>

<mosaic_0001>
module attributes {stable_mosaic.version = 11 : i64} {
  func.func @_layernorm_kernel(%arg0: i32, %arg1: memref<8x32xf32, #tpu.memory_space<vmem>>, %arg2: memref<8x32xf32, #tpu.memory_space<vmem>>) attributes {dimension_semantics = [#tpu.dimension_semantics<parallel>], iteration_bounds = array<i64: 2>, scalar_prefetch = 0 : i64, scratch_operands = 0 : i64, tpu.core_type = #tpu.core_type<tc>, window_params = [{transform_indices = @transform_0, window_bounds = array<i64: 8, 32>}, {transform_indices = @transform_1, window_bounds = array<i64: 8, 32>}]} {
    %c0 = arith.constant 0 : index
    %c0_0 = arith.constant 0 : index
    %0 = vector.load %arg1[%c0, %c0_0] : memref<8x32xf32, #tpu.memory_space<vmem>>, vector<8x32xf32>
    %cst = arith.constant dense<0.000000e+00> : vector<8xf32>
    %1 = vector.multi_reduction <add>, %0, %cst [1] : vector<8x32xf32> to vector<8xf32>
    %2 = vector.shape_cast %1 : vector<8xf32> to vector<8x1xf32>
    %cst_1 = arith.constant 3.125000e-02 : f32
    %3 = vector.broadcast %cst_1 : f32 to vector<8x1xf32>
    %4 = arith.mulf %2, %3 : vector<8x1xf32>
    %5 = vector.broadcast %4 : vector<8x1xf32> to vector<8x32xf32>
    %6 = arith.subf %0, %5 : vector<8x32xf32>
    %7 = arith.mulf %6, %6 : vector<8x32xf32>
    %cst_2 = arith.constant dense<0.000000e+00> : vector<8xf32>
    %8 = vector.multi_reduction <add>, %7, %cst_2 [1] : vector<8x32xf32> to vector<8xf32>
    %9 = vector.shape_cast %8 : vector<8xf32> to vector<8x1xf32>
    %cst_3 = arith.constant 3.100000e+01 : f32
    %10 = vector.broadcast %cst_3 : f32 to vector<8x1xf32>
    %11 = arith.divf %10, %9 : vector<8x1xf32>
    %12 = vector.broadcast %11 : vector<8x1xf32> to vector<8x32xf32>
    %13 = arith.mulf %6, %12 : vector<8x32xf32>
    %c0_4 = arith.constant 0 : index
    %c0_5 = arith.constant 0 : index
    %14 = vector.load %arg2[%c0_4, %c0_5] : memref<8x32xf32, #tpu.memory_space<vmem>>, vector<8x32xf32>
    tpu.vector_store %arg2[%c0_4, %c0_5], %13 {strides = array<i32>} : memref<8x32xf32, #tpu.memory_space<vmem>>, vector<8x32xf32>,
    return
  }
  func.func @transform_0(%arg0: i32) -> (i32, i32) {
    %c0_i32 = arith.constant 0 : i32
    %c0_i32_0 = arith.constant 0 : i32
    return %arg0, %c0_i32 : i32, i32
  }
  func.func @transform_1(%arg0: i32) -> (i32, i32) {
    %c0_i32 = arith.constant 0 : i32
    %c0_i32_0 = arith.constant 0 : i32
    return %arg0, %c0_i32 : i32, i32
  }
}

</mosaic_0001>

<bundles_post_ra>
// kernel: tpu_custom_call.1
= control target key start
LH: loop header
LB: loop body
LE: loop exit
PB: predicated region body
PF: predicated region fallthrough
CT: control target
= control target key end

     0   :  { %6 = vsyncpa [#allocation3], 0  ;;  %s565_s0 = inlined_call_operand.hbm [shape: f32[16,32], index: 0, kind: input, shape index: {}]   ;;  %s566_s1 = inlined_call_operand.hbm [shape: f32[16,32], index: 1, kind: output, shape index: {}]  }
   0x1   :  { %8 = vsyncpa [#allocation3 + $0x1], 0 }
   0x2   :  { %9 = vsyncpa [#allocation4], 0 }
   0x3   :  { %11 = vsyncpa [#allocation4 + $0x1], 0  ;;  %s401_s6 = smov 0   ;;  %s403_s7 = smov 0  }
   0x4   :  { %s405_s8 = smov 0   ;;  %s407_s9 = smov 0  }
   0x5 LB: > { %s422_s10 = sadd.s32 4294967295, %s387_s9   ;;  %s231_s11 = sadd.s32 4294967294, %s387_s9   ;;  %s387_s9 = sphi %s407_s9, %s581_s9   ;;  %s383_s8 = sphi %s405_s8, %s580_s8   ;;  %s379_s7 = sphi %s403_s7, %s579_s7   ;;  %s375_s6 = sphi %s401_s6, %s578_s6  }
   0x6   : > { %s426_s12 = sadd.s32 1, %s387_s9   ;;  %s24_s13 = sadd.s32 1, %s383_s8 }
   0x7   : > { %s21_s14 = ssub.s32 %s387_s9, %s426_s12  ;;  %p31_p0 = scmp.ne.s32.totalorder %s383_s8, %s379_s7 }
   0x8   : > { %p22_p1 = scmp.eq.s32.totalorder %s21_s14, 0  ;;  %p32_p2 = scmp.eq.s32.totalorder %s387_s9, 0 }
   0x9   : > { %p37_p3 = scmp.ne.s32.totalorder %s379_s7, %s375_s6  ;;  %p38_p4 = scmp.eq.s32.totalorder %s422_s10, 0 }
   0xa   : > { %s438_s15 = scalar_select %p22_p1, %s383_s8, %s24_s13  }
   0xb   : > { %p440_p5 = por %p32_p2, %p31_p0  ;;  %p444_p6 = por %p38_p4, %p37_p3 }
   0xc   : > { %p61_p7 = scmp.eq.s32.totalorder %s422_s10, 1  ;;  %p67_p8 = scmp.eq.s32.totalorder %s231_s11, 1 }
   0xd   : > { %p255_p10 = scmp.lt.s32.totalorder %s387_s9, 2  ;;  %s87_s20 = sand.u32 1, %s383_s8  }
   0xe   : > { %p451_p11 = por %p61_p7, %p31_p0  ;;  %p455_p12 = por %p67_p8, %p37_p3 }
   0xf   : > { %s235_s21 = sshll.u32 %s387_s9, 7  ;;  %s234_s22 = sshll.u32 %s87_s20, 3 }
  0x10   : > { %s570_s18 = scalar_select %p451_p11, 1, 0 }
  0x11   : > { %s571_s19 = scalar_select %p455_p12, 1, 0 }
  0x12   : > { %s464_s25 = scalar_lea.hbm %s565_s0, %s235_s21  ;;  %s91_s26 = scalar_lea.vmem [#allocation2], %s234_s22 }
  0x13   : > { %s98_s27 = sshll.u32 %s91_s26, 4  ;;  %p468_p13 = pnand %p255_p10, %p440_p5  ;;  %s472_s27 = int_to_ptr.vmem [resolvable:$true] %s98_s27 }
  0x14   : > { %s88_s29 = scalar_lea.sflag [#allocation3], %s87_s20  ;;  %s291_s30 = scalar_lea.hbm %s464_s25, 128 }
  0x15   : > { %p292_p2 = scmp.ne.s32.totalorder %s464_s25, %s291_s30  ;;  %p293_p3 = pneg %p468_p13 }
  0x16   : > { %s296_s4 = scalar_lea.hbm %s565_s0, 256  ;;  %p297_p5 = scmp.lt.u32.totalorder %s464_s25, %s565_s0 }
  0x17   : > { %p294_p4 = pnand %p293_p3, %p292_p2  ;;  %p298_p8 = scmp.lt.u32.totalorder %s296_s4, %s291_s30 }
  0x18   : > { %p300_p9 = scmp.lt.u32.totalorder %s291_s30, %s464_s25 }
  0x19   : > { %p295_p7 = pneg %p294_p4  ;;  %p299_p10 = por %p298_p8, %p297_p5 }
  0x1b   : > { %p301_p0 = por %p300_p9, %p299_p10 }
  0x1d   : > { %p302_p1 = pnand %p301_p0, %p295_p7 }
  0x1f   : > { %305 = shalt.err (!%p302_p1)
}
  0x20   : > { %s306_s13 = scalar_lea.vmem %s472_s27, 128  ;;  %s389_s14 = smov [#allocation2]  }
  0x21   : > { %p307_p2 = scmp.ne.s32.totalorder %s472_s27, %s306_s13  ;;  %s311_s16 = sshll.u32 %s389_s14, 4  ;;  %s312_s16 = int_to_ptr.vmem [resolvable:$false] %s311_s16 }
  0x22   : > { %s313_s20 = scalar_lea.vmem %s312_s16, 256  ;;  %p314_p11 = scmp.lt.s32.totalorder %s472_s27, %s312_s16 }
  0x23   : > { %p309_p4 = pnand %p307_p2, %p293_p3  ;;  %p315_p5 = scmp.lt.s32.totalorder %s313_s20, %s306_s13 }
  0x25   : > { %p310_p12 = pneg %p309_p4  ;;  %p316_p8 = por %p315_p5, %p314_p11 }
  0x27   : > { %p317_p9 = pnand %p316_p8, %p310_p12 }
  0x29   : > { %320 = shalt.err (!%p317_p9)
}
  0x2a   : > { %250 = dma.hbm_to_vmem [thread:$0]  (!%p468_p13), %s464_s25, 128, %s472_s27, %s88_s29  }
  0x2b   : > { %p573_p0 = scmp.lt.s32.totalorder %s387_s9, 3  ;;  %p574_p1 = scmp.ge.s32.totalorder %s387_s9, 1 }
  0x2d   : > { %p104_p3 = pnand %p574_p1, %p573_p0 }
  0x2e   : > { %s506_s21 = sand.u32 (!%p104_p3), 1, %s379_s7  }
  0x2f   : > { %107 = sbr.rel (%p104_p3) target bundleno = 377 (0x179), region = 24  ;;  %s237_s22 = sshll.u32 (!%p104_p3), %s506_s21, 3 }
  0x30   : > { %s110_s23 = scalar_lea.sflag (!%p104_p3), [#allocation3], %s506_s21  ;;  %s113_s24 = scalar_lea.vmem (!%p104_p3), [#allocation2], %s237_s22 }
  0x36   : > { %366 = dma.done.wait (%p444_p6), %s110_s23, 128  }
  0x37   : > { %368 = vsyncadd (%p444_p6), %s110_s23, 4294967168  ;;  %vm133_vm0 = vcmask 261120   ;;  %v132_v0 = vld [vmem:[%s113_s24] sm:$0xff]  ;;  %s240_s17 = sshll.u32 %s422_s10, 7  ;;  %s131_s25 = scalar_lea.vmem [#allocation5], %s237_s22 }
  0x38   : > { %v134_v1 = vsel %vm133_vm0, %v132_v0, 0.0  ;;  %s161_s26 = sshll.u32 %s131_s25, 4  ;;  %s520_s29 = scalar_lea.hbm %s566_s1, %s240_s17  ;;  %s522_s26 = int_to_ptr.vmem [resolvable:$true] %s161_s26 }
  0x39   : > { %135 = vadd.xlane.f32.xlu0 %v134_v1  ;;  %s148_s30 = scalar_lea.sflag [#allocation4], %s506_s21  ;;  %s321_s2 = scalar_lea.vmem %s522_s26, 128 }
  0x3a   : > { %p322_p6 = scmp.ne.s32.totalorder %s522_s26, %s321_s2  ;;  %p575_p11 = scmp.ne.s32.totalorder %s570_s18, 0 }
  0x3b   : > { %s390_s10 = smov [#allocation5]  }
  0x3c   : > { %p323_p12 = pnand %p322_p6, %p575_p11  ;;  %s325_s3 = sshll.u32 %s390_s10, 4  ;;  %s326_s3 = int_to_ptr.vmem [resolvable:$false] %s325_s3 }
  0x3d   : > { %s327_s4 = scalar_lea.vmem %s326_s3, 256  ;;  %p328_p7 = scmp.lt.s32.totalorder %s522_s26, %s326_s3 }
  0x3e   : > { %p324_p13 = pneg %p323_p12  ;;  %p329_p10 = scmp.lt.s32.totalorder %s327_s4, %s321_s2 }
  0x40   : > { %p330_p2 = por %p329_p10, %p328_p7 }
  0x42   : > { %p331_p4 = pnand %p330_p2, %p324_p13 }
  0xc6   : > { %v136_v2 = vpop.xlane.xlu0 %135 }
  0xc7   : > { %v137_v3 = vmul.f32 0.03125, %v136_v2 }
  0xc9   : > { %v138_v4 = vsub.f32 %v132_v0, %v137_v3 }
  0xcb   : > { %v139_v5 = vmul.f32 %v138_v4, %v138_v4 }
  0xcd   : > { %v140_v6 = vsel %vm133_vm0, %v139_v5, 0.0 }
  0xce   : > { %141 = vadd.xlane.f32.xlu0 %v140_v6 }
 0x15b   : > { %v142_v7 = vpop.xlane.xlu0 %141 }
 0x15c   : > { %289 = vrcp.f32 %v142_v7 }
 0x166   : > { %v290_v8 = vpop.eup %289 }
 0x167   : > { %v144_v9 = vmul.f32 31.0, %v290_v8 }
 0x169   : > { %v145_v10 = vmul.f32 %v144_v9, %v138_v4 }
 0x16b   : > { %146 = vst.msk [vmem:[%s131_s25] sm:$0xff] %vm133_vm0, %v145_v10 }
 0x16c   : > { %334 = shalt.err (!%p331_p4)
}
 0x16d   : > { %s335_s5 = scalar_lea.hbm %s520_s29, 128  ;;  %s339_s14 = scalar_lea.hbm %s566_s1, 256 }
 0x16e   : > { %p336_p5 = scmp.ne.s32.totalorder %s520_s29, %s335_s5  ;;  %p340_p0 = scmp.lt.u32.totalorder %s520_s29, %s566_s1 }
 0x16f   : > { %p341_p1 = scmp.lt.u32.totalorder %s339_s14, %s335_s5  ;;  %p343_p6 = scmp.lt.u32.totalorder %s335_s5, %s520_s29 }
 0x170   : > { %p337_p8 = pnand %p336_p5, %p575_p11 }
 0x171   : > { %p342_p3 = por %p341_p1, %p340_p0 }
 0x172   : > { %p338_p9 = pneg %p337_p8 }
 0x173   : > { %p344_p12 = por %p343_p6, %p342_p3 }
 0x175   : > { %p345_p13 = pnand %p344_p12, %p338_p9 }
 0x177   : > { %348 = shalt.err (!%p345_p13)
}
 0x178   : > { %245 = dma.vmem_to_hbm [thread:$0]  (%p575_p11), %s522_s26, 128, %s520_s29, %s148_s30  }
 0x179 PF: > { %s173_s21 = sand.u32 1, %s375_s6   ;;  %p576_p7 = scmp.ne.s32.totalorder %s571_s19, 0 }
 0x17a   : > { %p577_p10 = scmp.ge.s32.totalorder %s387_s9, 2  ;;  %s174_s22 = scalar_lea.sflag [#allocation4], %s173_s21 }
 0x17c   : > { %p252_p2 = pnand %p577_p10, %p576_p7 }
 0x17e   : > { %370 = dma.done.wait (!%p252_p2), %s174_s22, 128  }
 0x17f   : > { %372 = vsyncadd (!%p252_p2), %s174_s22, 4294967168  ;;  %p14_p4 = scmp.ge.s32.totalorder %s426_s12, 4   ;;  %s578_s6 = smov %s379_s7 }
 0x180   : > { %s579_s7 = smov %s383_s8  ;;  %s580_s8 = smov %s438_s15 }
 0x181   : > { %s581_s9 = smov %s426_s12  ;;  %16 = sbr.rel (!%p14_p4) target bundleno = 5 (0x5), region = 69 }
 0x188   :  { %179 = vsyncpa [#allocation3], 1 }
 0x189   :  { %181 = vsyncpa [#allocation3 + $0x1], 1 }
 0x18a   :  { %182 = vsyncpa [#allocation4], 1 }
 0x18b   :  { %184 = vsyncpa [#allocation4 + $0x1], 1 }

</bundles_post_ra>
